<compile_context>
chip_gen: v5e
topology: v5e:2x2
jax: 0.10.0
libtpu: 0.0.40
codegen_flags: <defaults>
</compile_context>

<pallas_src>
import functools
import math

import jax
import jax.numpy as jnp
from jax import lax
from jax.experimental import pallas as pl
from jax.experimental.pallas import tpu as pltpu


def _round_up(x, n):
    return ((x + n - 1) // n) * n


def _aam_loss_kernel(emb_ref, wt_ref, lab_ref, out_ref,
                     m_scr, l_scr, t_scr,
                     *, cos_m, sin_m, s, n_classes, c_tile):
    j = pl.program_id(1)  # class-tile index (reduction axis, last in grid)

    @pl.when(j == 0)
    def _init():
        m_scr[...] = jnp.full_like(m_scr, -jnp.inf)
        l_scr[...] = jnp.zeros_like(l_scr)
        t_scr[...] = jnp.zeros_like(t_scr)

    emb = emb_ref[...]          # (Bt, Dp)  bf16
    wt = wt_ref[...]            # (Dp, Ct)  bf16  (pre-transposed weights)
    labels = lab_ref[...]       # (Bt, 1)   int32

    # Cosine similarities for this (B, C) tile: bf16 MXU, f32 accumulation.
    cos_theta = jnp.dot(emb, wt, preferred_element_type=jnp.float32)  # (Bt, Ct) f32
    bt, ct = cos_theta.shape

    # Global class id of every column in this tile.
    col = j * c_tile + lax.broadcasted_iota(jnp.int32, (bt, ct), 1)
    onehot = (col == labels).astype(jnp.float32)   # 1.0 only on the target column
    valid = col < n_classes                        # mask class padding

    # Additive angular margin on the target column only (one sqrt per row):
    #   cos(theta+m) = cos_theta*cos(m) - sin(theta)*sin(m), sin(theta)=sqrt(1-cos^2).
    ct_tgt = jnp.sum(cos_theta * onehot, axis=-1, keepdims=True)      # (Bt, 1)
    st_tgt = jnp.sqrt(jnp.maximum(1.0 - ct_tgt * ct_tgt, 0.0))        # (Bt, 1)
    delta = s * ((ct_tgt * cos_m - st_tgt * sin_m) - ct_tgt)          # (Bt, 1)
    has_tgt = jnp.sum(onehot, axis=-1, keepdims=True)                 # 1 iff target in tile

    logits = s * cos_theta + onehot * delta                           # margin applied in-tile
    logits = jnp.where(valid, logits, -1e30)                          # kill padded classes

    # Online (flash) logsumexp accumulation across class tiles.
    m_prev = m_scr[...]
    m_new = jnp.maximum(m_prev, jnp.max(logits, axis=-1, keepdims=True))
    alpha = jnp.exp(m_prev - m_new)
    l_scr[...] = alpha * l_scr[...] + jnp.sum(jnp.exp(logits - m_new),
                                              axis=-1, keepdims=True)
    m_scr[...] = m_new
    # Margined target logit (exactly one class tile contributes per row).
    t_scr[...] = t_scr[...] + has_tgt * (s * ct_tgt + delta)

    @pl.when(j == pl.num_programs(1) - 1)
    def _finalize():
        lse = m_scr[...] + jnp.log(l_scr[...])
        out_ref[...] = (lse - t_scr[...]).astype(out_ref.dtype)       # per-example CE


def angular_margin_loss(embeddings, weights, labels, *, m, s, number_of_classes,
                        b_tile=None, c_tile=None):
    """Pallas TPU implementation of AngularMarginLoss.forward (mean CE scalar)."""
    B, D = embeddings.shape
    C, D2 = weights.shape
    assert D == D2 and C == number_of_classes

    # Tile choices: lane-dense class tiles (multiple of 128), sublane-aligned B tiles.
    if b_tile is None:
        b_tile = min(256, _round_up(B, 8))
    if c_tile is None:
        c_tile = min(1024, _round_up(C, 128))

    B_pad = _round_up(B, b_tile)
    C_pad = _round_up(C, c_tile)
    D_pad = _round_up(D, 128)

    # Pad + cast once in the wrapper (halves HBM traffic for the weight stream).
    emb = jnp.pad(embeddings.astype(jnp.float32),
                  ((0, B_pad - B), (0, D_pad - D))).astype(jnp.bfloat16)
    # Pre-transposed (D, C) weight layout: contracting dim in canonical MXU position.
    wt = jnp.pad(weights.astype(jnp.float32),
                 ((0, C_pad - C), (0, D_pad - D))).T.astype(jnp.bfloat16)
    lab = jnp.pad(labels.astype(jnp.int32), (0, B_pad - B)).reshape(B_pad, 1)

    nb = B_pad // b_tile
    nc = C_pad // c_tile

    kernel = functools.partial(
        _aam_loss_kernel,
        cos_m=float(math.cos(m)), sin_m=float(math.sin(m)), s=float(s),
        n_classes=C, c_tile=c_tile)

    # Rough double-buffered VMEM working set; raise scoped limit only if needed
    # (capped at 64 MiB so it stays valid on v7x's smaller physical VMEM).
    est_bytes = (2 * 2 * (b_tile * D_pad + D_pad * c_tile)   # bf16 inputs, 2 buffers
                 + 4 * b_tile * c_tile                       # f32 logits tile
                 + 4 * 3 * b_tile + 2 * 4 * b_tile)          # scratch + out buffers
    cp_kwargs = dict(dimension_semantics=("parallel", "arbitrary"))
    if est_bytes > 28 * 1024 * 1024:
        cp_kwargs["vmem_limit_bytes"] = int(min(est_bytes + (8 << 20), 64 << 20))

    cost = pl.CostEstimate(
        flops=2 * B_pad * C_pad * D_pad,
        transcendentals=B_pad * C_pad + 2 * B_pad * nc,
        bytes_accessed=(B_pad * D_pad * 2 * nc          # embeddings re-read per C tile
                        + C_pad * D_pad * 2 * nb        # weights re-read per B tile
                        + B_pad * 4 * nc + B_pad * 4),  # labels + output
    )

    out = pl.pallas_call(
        kernel,
        out_shape=jax.ShapeDtypeStruct((B_pad, 1), jnp.float32),
        grid_spec=pltpu.PrefetchScalarGridSpec(
            num_scalar_prefetch=0,
            grid=(nb, nc),
            in_specs=[
                pl.BlockSpec((b_tile, D_pad), lambda i, j: (i, 0)),   # embeddings
                pl.BlockSpec((D_pad, c_tile), lambda i, j: (0, j)),   # weights (D, C)
                pl.BlockSpec((b_tile, 1), lambda i, j: (i, 0)),       # labels
            ],
            out_specs=pl.BlockSpec((b_tile, 1), lambda i, j: (i, 0)),
            scratch_shapes=[pltpu.VMEM((b_tile, 1), jnp.float32)] * 3,  # m_i, l_i, tgt
        ),
        compiler_params=pltpu.CompilerParams(**cp_kwargs),
        cost_estimate=cost,
    )(emb, wt, lab)

    # Final mean over the real (unpadded) batch in plain JAX.
    return jnp.mean(out[:B, 0])


def _reference_loss(embeddings, weights, labels, *, m, s):
    """Pure-JAX reference mirroring the PyTorch module (acos + cos path)."""
    cos_theta = embeddings @ weights.T
    theta = jnp.arccos(jnp.clip(cos_theta, -1.0, 1.0))
    onehot = jax.nn.one_hot(labels, weights.shape[0], dtype=jnp.float32)
    logits = s * jnp.cos(theta + m * onehot)
    logp = jax.nn.log_softmax(logits, axis=-1)
    return -jnp.mean(jnp.sum(onehot * logp, axis=-1))


if __name__ == "__main__":
    B, D, C = 8, 32, 16
    m, s = 0.5, 30.0

    key = jax.random.PRNGKey(0)
    k_emb, k_w, k_lab = jax.random.split(key, 3)

    # Normalized embeddings / class weights so cos_theta lies in [-1, 1]
    # (the acos in the reference module is only well-defined there).
    emb = jax.random.normal(k_emb, (B, D), dtype=jnp.float32)
    emb = emb / jnp.linalg.norm(emb, axis=-1, keepdims=True)
    w = jax.random.normal(k_w, (C, D), dtype=jnp.float32)
    w = w / jnp.linalg.norm(w, axis=-1, keepdims=True)
    labels = jax.random.randint(k_lab, (B,), 0, C, dtype=jnp.int32)

    loss = angular_margin_loss(emb, w, labels, m=m, s=s, number_of_classes=C)
    loss = jax.block_until_ready(loss)

    # Tight check vs a reference fed the same bf16-rounded matmul operands
    # (kernel streams bf16 into the MXU with f32 accumulation).
    emb_bf = emb.astype(jnp.bfloat16).astype(jnp.float32)
    w_bf = w.astype(jnp.bfloat16).astype(jnp.float32)
    ref_bf = jax.block_until_ready(_reference_loss(emb_bf, w_bf, labels, m=m, s=s))
    # Loose sanity check vs the full-f32 reference (bf16 operand rounding only).
    ref_f32 = jax.block_until_ready(_reference_loss(emb, w, labels, m=m, s=s))

    assert jnp.isfinite(loss), f"non-finite loss: {loss}"
    assert abs(float(loss) - float(ref_bf)) < 5e-3, f"mismatch: {loss} vs {ref_bf}"
    assert abs(float(loss) - float(ref_f32)) < max(0.25, 0.02 * abs(float(ref_f32))), (
        f"mismatch vs f32 ref: {loss} vs {ref_f32}")

    print("KERNEL_OK")
</pallas_src>

<mosaic_0001>
module attributes {stable_mosaic.version = 11 : i64} {
  func.func @_aam_loss_kernel(%arg0: i32, %arg1: i32, %arg2: memref<8x128xbf16, #tpu.memory_space<vmem>>, %arg3: memref<128x128xbf16, #tpu.memory_space<vmem>>, %arg4: memref<8x1xi32, #tpu.memory_space<vmem>>, %arg5: memref<8x1xf32, #tpu.memory_space<vmem>>, %arg6: memref<8x1xf32, #tpu.memory_space<vmem>>, %arg7: memref<8x1xf32, #tpu.memory_space<vmem>>, %arg8: memref<8x1xf32, #tpu.memory_space<vmem>>) attributes {dimension_semantics = [#tpu.dimension_semantics<parallel>, #tpu.dimension_semantics<arbitrary>], iteration_bounds = array<i64: 1, 1>, scalar_prefetch = 0 : i64, scratch_operands = 3 : i64, tpu.core_type = #tpu.core_type<tc>, window_params = [{transform_indices = @transform_0, window_bounds = array<i64: 8, 128>}, {transform_indices = @transform_1, window_bounds = array<i64: 128, 128>}, {transform_indices = @transform_2, window_bounds = array<i64: 8, 1>}, {transform_indices = @transform_3, window_bounds = array<i64: 8, 1>}]} {
    %c0_i32 = arith.constant 0 : i32
    %0 = arith.cmpi eq, %arg1, %c0_i32 : i32
    %1 = arith.extui %0 : i1 to i32
    %c0_i32_0 = arith.constant 0 : i32
    %2 = arith.cmpi ne, %1, %c0_i32_0 : i32
    scf.if %2 {
      %cst_32 = arith.constant 0xFF800000 : f32
      %69 = vector.broadcast %cst_32 : f32 to vector<8x1xf32>
      %c0_33 = arith.constant 0 : index
      %c0_34 = arith.constant 0 : index
      %70 = vector.load %arg6[%c0_33, %c0_34] : memref<8x1xf32, #tpu.memory_space<vmem>>, vector<8x1xf32>
      tpu.vector_store %arg6[%c0_33, %c0_34], %69 {strides = array<i32>} : memref<8x1xf32, #tpu.memory_space<vmem>>, vector<8x1xf32>,
      %cst_35 = arith.constant 0.000000e+00 : f32
      %71 = vector.broadcast %cst_35 : f32 to vector<8x1xf32>
      %c0_36 = arith.constant 0 : index
      %c0_37 = arith.constant 0 : index
      %72 = vector.load %arg7[%c0_36, %c0_37] : memref<8x1xf32, #tpu.memory_space<vmem>>, vector<8x1xf32>
      tpu.vector_store %arg7[%c0_36, %c0_37], %71 {strides = array<i32>} : memref<8x1xf32, #tpu.memory_space<vmem>>, vector<8x1xf32>,
      %cst_38 = arith.constant 0.000000e+00 : f32
      %73 = vector.broadcast %cst_38 : f32 to vector<8x1xf32>
      %c0_39 = arith.constant 0 : index
      %c0_40 = arith.constant 0 : index
      %74 = vector.load %arg8[%c0_39, %c0_40] : memref<8x1xf32, #tpu.memory_space<vmem>>, vector<8x1xf32>
      tpu.vector_store %arg8[%c0_39, %c0_40], %73 {strides = array<i32>} : memref<8x1xf32, #tpu.memory_space<vmem>>, vector<8x1xf32>,
    } else {
    }
    %c0 = arith.constant 0 : index
    %c0_1 = arith.constant 0 : index
    %3 = vector.load %arg2[%c0, %c0_1] : memref<8x128xbf16, #tpu.memory_space<vmem>>, vector<8x128xbf16>
    %c0_2 = arith.constant 0 : index
    %c0_3 = arith.constant 0 : index
    %4 = vector.load %arg3[%c0_2, %c0_3] : memref<128x128xbf16, #tpu.memory_space<vmem>>, vector<128x128xbf16>
    %c0_4 = arith.constant 0 : index
    %c0_5 = arith.constant 0 : index
    %5 = vector.load %arg4[%c0_4, %c0_5] : memref<8x1xi32, #tpu.memory_space<vmem>>, vector<8x1xi32>
    %cst = arith.constant dense<0.000000e+00> : vector<8x128xf32>
    %6 = tpu.matmul %3, %4, %cst {dimension_numbers = #tpu.dot_dimension_numbers<[1], [0], [0], [1], [0, 0, 1, 1], [], []>} : vector<8x128xbf16>, vector<128x128xbf16>, vector<8x128xf32> -> vector<8x128xf32>
    %c128_i32 = arith.constant 128 : i32
    %7 = arith.muli %arg1, %c128_i32 : i32
    %8 = tpu.iota {dimensions = array<i32: 1>} : vector<8x128xi32>
    %9 = vector.broadcast %7 : i32 to vector<8x128xi32>
    %10 = arith.addi %9, %8 : vector<8x128xi32>
    %11 = vector.broadcast %5 : vector<8x1xi32> to vector<8x128xi32>
    %12 = arith.cmpi eq, %10, %11 : vector<8x128xi32>
    %13 = arith.extui %12 : vector<8x128xi1> to vector<8x128xi32>
    %14 = arith.sitofp %13 : vector<8x128xi32> to vector<8x128xf32>
    %c16_i32 = arith.constant 16 : i32
    %15 = vector.broadcast %c16_i32 : i32 to vector<8x128xi32>
    %16 = arith.cmpi slt, %10, %15 : vector<8x128xi32>
    %17 = arith.mulf %6, %14 : vector<8x128xf32>
    %cst_6 = arith.constant dense<0.000000e+00> : vector<8xf32>
    %18 = vector.multi_reduction <add>, %17, %cst_6 [1] : vector<8x128xf32> to vector<8xf32>
    %19 = vector.shape_cast %18 : vector<8xf32> to vector<8x1xf32>
    %20 = arith.mulf %19, %19 : vector<8x1xf32>
    %cst_7 = arith.constant 1.000000e+00 : f32
    %21 = vector.broadcast %cst_7 : f32 to vector<8x1xf32>
    %22 = arith.subf %21, %20 : vector<8x1xf32>
    %cst_8 = arith.constant 0.000000e+00 : f32
    %23 = vector.broadcast %cst_8 : f32 to vector<8x1xf32>
    %24 = arith.maximumf %22, %23 : vector<8x1xf32>
    %25 = math.sqrt %24 : vector<8x1xf32>
    %cst_9 = arith.constant 0.87758255 : f32
    %26 = vector.broadcast %cst_9 : f32 to vector<8x1xf32>
    %27 = arith.mulf %19, %26 : vector<8x1xf32>
    %cst_10 = arith.constant 0.47942555 : f32
    %28 = vector.broadcast %cst_10 : f32 to vector<8x1xf32>
    %29 = arith.mulf %25, %28 : vector<8x1xf32>
    %30 = arith.subf %27, %29 : vector<8x1xf32>
    %31 = arith.subf %30, %19 : vector<8x1xf32>
    %cst_11 = arith.constant 3.000000e+01 : f32
    %32 = vector.broadcast %cst_11 : f32 to vector<8x1xf32>
    %33 = arith.mulf %32, %31 : vector<8x1xf32>
    %cst_12 = arith.constant dense<0.000000e+00> : vector<8xf32>
    %34 = vector.multi_reduction <add>, %14, %cst_12 [1] : vector<8x128xf32> to vector<8xf32>
    %35 = vector.shape_cast %34 : vector<8xf32> to vector<8x1xf32>
    %cst_13 = arith.constant 3.000000e+01 : f32
    %36 = vector.broadcast %cst_13 : f32 to vector<8x128xf32>
    %37 = arith.mulf %36, %6 : vector<8x128xf32>
    %38 = vector.broadcast %33 : vector<8x1xf32> to vector<8x128xf32>
    %39 = arith.mulf %14, %38 : vector<8x128xf32>
    %40 = arith.addf %37, %39 : vector<8x128xf32>
    %cst_14 = arith.constant -1.000000e+30 : f32
    %41 = vector.broadcast %cst_14 : f32 to vector<8x128xf32>
    %42 = arith.select %16, %40, %41 : vector<8x128xi1>, vector<8x128xf32>
    %c0_15 = arith.constant 0 : index
    %c0_16 = arith.constant 0 : index
    %43 = vector.load %arg6[%c0_15, %c0_16] : memref<8x1xf32, #tpu.memory_space<vmem>>, vector<8x1xf32>
    %cst_17 = arith.constant dense<0xFF800000> : vector<8xf32>
    %44 = vector.multi_reduction <maximumf>, %42, %cst_17 [1] : vector<8x128xf32> to vector<8xf32>
    %45 = vector.shape_cast %44 : vector<8xf32> to vector<8x1xf32>
    %46 = arith.maximumf %43, %45 : vector<8x1xf32>
    %47 = arith.subf %43, %46 : vector<8x1xf32>
    %48 = math.exp %47 : vector<8x1xf32>
    %c0_18 = arith.constant 0 : index
    %c0_19 = arith.constant 0 : index
    %49 = vector.load %arg7[%c0_18, %c0_19] : memref<8x1xf32, #tpu.memory_space<vmem>>, vector<8x1xf32>
    %50 = arith.mulf %48, %49 : vector<8x1xf32>
    %51 = vector.broadcast %46 : vector<8x1xf32> to vector<8x128xf32>
    %52 = arith.subf %42, %51 : vector<8x128xf32>
    %53 = math.exp %52 : vector<8x128xf32>
    %cst_20 = arith.constant dense<0.000000e+00> : vector<8xf32>
    %54 = vector.multi_reduction <add>, %53, %cst_20 [1] : vector<8x128xf32> to vector<8xf32>
    %55 = vector.shape_cast %54 : vector<8xf32> to vector<8x1xf32>
    %56 = arith.addf %50, %55 : vector<8x1xf32>
    %c0_21 = arith.constant 0 : index
    %c0_22 = arith.constant 0 : index
    %57 = vector.load %arg7[%c0_21, %c0_22] : memref<8x1xf32, #tpu.memory_space<vmem>>, vector<8x1xf32>
    tpu.vector_store %arg7[%c0_21, %c0_22], %56 {strides = array<i32>} : memref<8x1xf32, #tpu.memory_space<vmem>>, vector<8x1xf32>,
    %c0_23 = arith.constant 0 : index
    %c0_24 = arith.constant 0 : index
    %58 = vector.load %arg6[%c0_23, %c0_24] : memref<8x1xf32, #tpu.memory_space<vmem>>, vector<8x1xf32>
    tpu.vector_store %arg6[%c0_23, %c0_24], %46 {strides = array<i32>} : memref<8x1xf32, #tpu.memory_space<vmem>>, vector<8x1xf32>,
    %c0_25 = arith.constant 0 : index
    %c0_26 = arith.constant 0 : index
    %59 = vector.load %arg8[%c0_25, %c0_26] : memref<8x1xf32, #tpu.memory_space<vmem>>, vector<8x1xf32>
    %cst_27 = arith.constant 3.000000e+01 : f32
    %60 = vector.broadcast %cst_27 : f32 to vector<8x1xf32>
    %61 = arith.mulf %60, %19 : vector<8x1xf32>
    %62 = arith.addf %61, %33 : vector<8x1xf32>
    %63 = arith.mulf %35, %62 : vector<8x1xf32>
    %64 = arith.addf %59, %63 : vector<8x1xf32>
    %c0_28 = arith.constant 0 : index
    %c0_29 = arith.constant 0 : index
    %65 = vector.load %arg8[%c0_28, %c0_29] : memref<8x1xf32, #tpu.memory_space<vmem>>, vector<8x1xf32>
    tpu.vector_store %arg8[%c0_28, %c0_29], %64 {strides = array<i32>} : memref<8x1xf32, #tpu.memory_space<vmem>>, vector<8x1xf32>,
    %c0_i32_30 = arith.constant 0 : i32
    %66 = arith.cmpi eq, %arg1, %c0_i32_30 : i32
    %67 = arith.extui %66 : i1 to i32
    %c0_i32_31 = arith.constant 0 : i32
    %68 = arith.cmpi ne, %67, %c0_i32_31 : i32
    scf.if %68 {
      %c0_32 = arith.constant 0 : index
      %c0_33 = arith.constant 0 : index
      %69 = vector.load %arg6[%c0_32, %c0_33] : memref<8x1xf32, #tpu.memory_space<vmem>>, vector<8x1xf32>
      %c0_34 = arith.constant 0 : index
      %c0_35 = arith.constant 0 : index
      %70 = vector.load %arg7[%c0_34, %c0_35] : memref<8x1xf32, #tpu.memory_space<vmem>>, vector<8x1xf32>
      %71 = math.log %70 : vector<8x1xf32>
      %72 = arith.addf %69, %71 : vector<8x1xf32>
      %c0_36 = arith.constant 0 : index
      %c0_37 = arith.constant 0 : index
      %73 = vector.load %arg8[%c0_36, %c0_37] : memref<8x1xf32, #tpu.memory_space<vmem>>, vector<8x1xf32>
      %74 = arith.subf %72, %73 : vector<8x1xf32>
      %c0_38 = arith.constant 0 : index
      %c0_39 = arith.constant 0 : index
      %75 = vector.load %arg5[%c0_38, %c0_39] : memref<8x1xf32, #tpu.memory_space<vmem>>, vector<8x1xf32>
      tpu.vector_store %arg5[%c0_38, %c0_39], %74 {strides = array<i32>} : memref<8x1xf32, #tpu.memory_space<vmem>>, vector<8x1xf32>,
    } else {
    }
    return
  }
  func.func @transform_0(%arg0: i32, %arg1: i32) -> (i32, i32) {
    %c0_i32 = arith.constant 0 : i32
    %c0_i32_0 = arith.constant 0 : i32
    return %arg0, %c0_i32 : i32, i32
  }
  func.func @transform_1(%arg0: i32, %arg1: i32) -> (i32, i32) {
    %c0_i32 = arith.constant 0 : i32
    %c0_i32_0 = arith.constant 0 : i32
    return %c0_i32, %arg1 : i32, i32
  }
  func.func @transform_2(%arg0: i32, %arg1: i32) -> (i32, i32) {
    %c0_i32 = arith.constant 0 : i32
    %c0_i32_0 = arith.constant 0 : i32
    return %arg0, %c0_i32 : i32, i32
  }
  func.func @transform_3(%arg0: i32, %arg1: i32) -> (i32, i32) {
    %c0_i32 = arith.constant 0 : i32
    %c0_i32_0 = arith.constant 0 : i32
    return %arg0, %c0_i32 : i32, i32
  }
}

</mosaic_0001>

<bundles_post_ra>
// kernel: tpu_custom_call.1
= control target key start
LH: loop header
LB: loop body
LE: loop exit
PB: predicated region body
PF: predicated region fallthrough
CT: control target
= control target key end

     0   :  { %8 = vsyncpa [#allocation6], 0  ;;  %s286_s15 = smov [#allocation5]   ;;  %s287_s17 = smov 64   ;;  %s331_s0 = inlined_call_operand.vmem [shape: bf16[8,128], index: 0, kind: input, shape index: {}]   ;;  %s332_s1 = inlined_call_operand.hbm [shape: bf16[128,128], index: 1, kind: input, shape index: {}]   ;;  %s333_s2 = inlined_call_operand.vmem [shape: s32[8,1], index: 2, kind: input, shape index: {}]   ;;  %s334_s3 = inlined_call_operand.vmem [shape: f32[8,1], index: 3, kind: output, shape index: {}]  }
   0x1   :  { %s15_s14 = sshll.u32 %s332_s1, 4  ;;  %s17_s16 = sshll.u32 %s286_s15, 4  ;;  %s16_s14 = int_to_ptr.hbm [resolvable:$true] %s15_s14  ;;  %s18_s16 = int_to_ptr.vmem [resolvable:$true] %s17_s16 }
   0x2   :  { %s288_s18 = smov 4  }
   0x3   :  { %23 = dma.hbm_to_vmem [thread:$0]  %s16_s14, 1024, %s18_s16, [#allocation6], %s287_s17, %s287_s17, %s288_s18  }
   0x4   :  { %284 = dma.done.wait [#allocation6], 1024  }
   0x5   :  { %285 = vsyncadd [#allocation6], 4294966272  ;;  %v243_v0 = vld [vmem:[#allocation5 + $0x38] sm:$0xff]  ;;  %vm34_vm0 = vcmask 7168   ;;  %v242_v1 = vld [vmem:[#allocation5 + $0x30] sm:$0xff]  ;;  %v289_v2 = vmov 0   ;;  %v118_v12 = vlaneseq }
   0x6   :  { %104 = vmatpush.bf16.msra.mxu0 %v243_v0  ;;  %250 = vset.pattern.permute.xlu0 %v289_v2  ;;  %v290_v3 = vmov 0.0   ;;  %v55_v4 = vld [vmem:[%s333_s2] sm:$0xff]  ;;  %v240_v6 = vld [vmem:[#allocation5 + $0x20] sm:$0xff]  ;;  %v239_v7 = vld [vmem:[#allocation5 + $0x18] sm:$0xff]  ;;  %v291_v23 = vmov -inf  }
   0x7   :  { %36 = vst.msk [vmem:[#allocation3] sm:$0xff] %vm34_vm0, %v290_v3  ;;  %251 = vset.pattern.permute.xlu1 %v289_v2  ;;  %123 = vperm.xlu0 %250, %v55_v4   ;;  %v241_v5 = vld [vmem:[#allocation5 + $0x28] sm:$0xff]  ;;  %v238_v8 = vld [vmem:[#allocation5 + $0x10] sm:$0xff]  ;;  %v236_v10 = vld [vmem:[#allocation5] sm:$0xff]  ;;  %v119_v13 = vand.u32 127, %v118_v12 }
   0x8   :  { %37 = vst.msk [vmem:[#allocation4] sm:$0xff] %vm34_vm0, %v290_v3  ;;  %v237_v9 = vld [vmem:[#allocation5 + $0x8] sm:$0xff] }
   0x9   :  { %v38_v11 = vld [vmem:[%s331_s0] sm:$0xf]  ;;  %35 = vst.msk [vmem:[#allocation2] sm:$0xff] %vm34_vm0, %v291_v23  ;;  %vm128_vm4 = vcmp.lt.s32.totalorder %v119_v13, 16 }
   0xa   :  { %105 = vmatpush.bf16.msra.mxu0 %v242_v1 }
   0xe   :  { %106 = vmatpush.bf16.msra.mxu0 %v241_v5  ;;  %v165_v55 = vld [vmem:[#allocation3] sm:$0xff] }
   0xf   :  { %v181_v59 = vld [vmem:[#allocation4] sm:$0xff] }
  0x10   :  { %v158_v45 = vld [vmem:[#allocation2] sm:$0xff] }
  0x12   :  { %107 = vmatpush.bf16.msra.mxu0 %v240_v6 }
  0x16   :  { %108 = vmatpush.bf16.msra.mxu0 %v239_v7 }
  0x1a   :  { %109 = vmatpush.bf16.msra.mxu0 %v238_v8 }
  0x1e   :  { %110 = vmatpush.bf16.msra.mxu0 %v237_v9 }
  0x22   :  { %111 = vmatpush.bf16.msra.mxu0 %v236_v10 }
  0x25   :  { %112 = vmatmul.bf16.vlgmr.msra.gmra.mxu0 %v38_v11 }
  0x79   :  { %v124_v14 = vpop.permute.xlu0 %123 }
  0x7a   :  { %vm125_vm1 = vcmp.eq.s32.totalorder %v119_v13, %v124_v14 }
  0x7b   :  { %v235_v15 = vsel %vm125_vm1, 1.0, %v290_v3 }
  0xa2   :  { %v113_v16 = vpop.f32.mrf.mxu0 }
  0xa3   :  { %v129_v17 = vmul.f32 %v235_v15, %v113_v16  ;;  %v154_v40 = vmul.f32 30.0, %v113_v16 }
  0xa5   :  { %130 = vadd.xlane.f32.xlu0 %v129_v17 }
  0xaa   :  { %v115_v18 = vpop.f32.mrf.mxu0 }
 0x118   :  { %v131_v19 = vpop.xlane.xlu0 %130 }
 0x119   :  { %v132_v20 = vmul.f32 %v131_v19, %v131_v19  ;;  %v147_v34 = vmul.f32 0.87758255, %v131_v19  ;;  %v182_v39 = vmul.f32 30.0, %v131_v19 }
 0x11b   :  { %v133_v21 = vsub.f32 1.0, %v132_v20 }
 0x11d   :  { %v134_v22 = vmax.f32 %v133_v21, 0.0 }
 0x11f   :  { %252 = vrsqrt.f32 %v134_v22  ;;  %vm142_vm2 = vcmp.eq.f32.partialorder %v134_v22, inf  ;;  %v145_v31 = vand.u32 2147483648, %v134_v22  ;;  %vm144_vm3 = vcmp.eq.f32.partialorder %v134_v22, 0.0 }
 0x125   :  { %v253_v24 = vpop.eup %252 }
 0x126   :  { %v136_v25 = vmul.f32 %v253_v24, %v134_v22 }
 0x128   :  { %v137_v26 = vmul.f32 %v253_v24, %v136_v25 }
 0x12a   :  { %v138_v27 = vmul.f32 0.5, %v137_v26 }
 0x12c   :  { %v139_v28 = vsub.f32 1.5, %v138_v27 }
 0x12e   :  { %v140_v29 = vmul.f32 %v253_v24, %v139_v28 }
 0x130   :  { %v141_v30 = vmul.f32 %v140_v29, %v134_v22 }
 0x132   :  { %v143_v32 = vsel %vm142_vm2, %v134_v22, %v141_v30 }
 0x133   :  { %v146_v33 = vsel %vm144_vm3, %v145_v31, %v143_v32 }
 0x134   :  { %v148_v35 = vmul.f32 0.47942555, %v146_v33 }
 0x136   :  { %v149_v36 = vsub.f32 %v147_v34, %v148_v35 }
 0x138   :  { %v150_v37 = vsub.f32 %v149_v36, %v131_v19 }
 0x13a   :  { %v151_v38 = vmul.f32 30.0, %v150_v37 }
 0x13c   :  { %v155_v41 = vmul.f32 %v235_v15, %v151_v38  ;;  %v183_v42 = vadd.f32 %v182_v39, %v151_v38 }
 0x13e   :  { %v156_v43 = vadd.f32 %v155_v41, %v154_v40 }
 0x140   :  { %v157_v44 = vsel %vm128_vm4, %v156_v43, -1e+30 }
 0x141   :  { %159 = vmax.xlane.f32.xlu1 %v157_v44 }
 0x1b4   :  { %v160_v46 = vpop.xlane.xlu1 %159 }
 0x1b5   :  { %v161_v47 = vmax.f32 %v158_v45, %v160_v46 }
 0x1b7   :  { %v162_v48 = vsub.f32 %v158_v45, %v161_v47  ;;  %180 = vst.msk [vmem:[#allocation2] sm:$0xff] %vm34_vm0, %v161_v47  ;;  %169 = vperm.xlu1 %251, %v161_v47  }
 0x1b9   :  { %v163_v53 = vmul.f32 1.442695, %v162_v48 }
 0x1be   :  { %v190_v2 = vld [vmem:[#allocation2] sm:$0xff] }
 0x229   :  { %v170_v49 = vpop.permute.xlu1 %169 }
 0x22a   :  { %v172_v50 = vsub.f32 %v157_v44, %v170_v49 }
 0x22c   :  { %v173_v51 = vmul.f32 1.442695, %v172_v50 }
 0x22e   :  { %254 = vpow2.f32 %v173_v51 }
 0x22f   :  { %256 = vpow2.f32 %v163_v53 }
 0x234   :  { %v255_v52 = vpop.eup %254 }
 0x235   :  { %175 = vadd.xlane.f32.xlu2 %v255_v52  ;;  %v257_v54 = vpop.eup %256 }
 0x236   :  { %v166_v56 = vmul.f32 %v257_v54, %v165_v55 }
 0x23d   :  { %152 = vadd.xlane.f32.xlu2 %v235_v15 }
 0x2a8   :  { %v176_v57 = vpop.xlane.xlu2 %175 }
 0x2a9   :  { %v177_v58 = vadd.f32 %v176_v57, %v166_v56 }
 0x2ab   :  { %179 = vst.msk [vmem:[#allocation3] sm:$0xff] %vm34_vm0, %v177_v58 }
 0x2b0   :  { %v153_v60 = vpop.xlane.xlu2 %152 }
 0x2b1   :  { %v184_v61 = vmul.f32 %v183_v42, %v153_v60 }
 0x2b2   :  { %v191_v62 = vld [vmem:[#allocation3] sm:$0xff] }
 0x2b3   :  { %258 = vlog2.f32 %v191_v62  ;;  %v185_v63 = vadd.f32 %v184_v61, %v181_v59 }
 0x2b5   :  { %186 = vst.msk [vmem:[#allocation4] sm:$0xff] %vm34_vm0, %v185_v63 }
 0x2b9   :  { %v259_v0 = vpop.eup %258 }
 0x2ba   :  { %v193_v1 = vmul.f32 0.6931472, %v259_v0 }
 0x2bc   :  { %v194_v3 = vadd.f32 %v193_v1, %v190_v2  ;;  %v195_v4 = vld [vmem:[#allocation4] sm:$0xff] }
 0x2be   :  { %v196_v5 = vsub.f32 %v194_v3, %v195_v4 }
 0x2c0   :  { %197 = vst.msk [vmem:[%s334_s3] sm:$0xff] %vm34_vm0, %v196_v5 }
 0x2c1   :  { %202 = vsyncpa [#allocation6], 1 }

</bundles_post_ra>
